<compile_context>
chip_gen: v6e
topology: v6e:2x2x1
jax: 0.10.0
libtpu: 0.0.40
codegen_flags: <defaults>
</compile_context>

<pallas_src>
import jax
import jax.numpy as jnp
from jax import lax
from jax.experimental import pallas as pl
from jax.experimental.pallas import tpu as pltpu


def drtnn_kernel(gu_ref, gi_ref, b1_ref,
                 w2_ref, b2_ref,
                 w3_ref, b3_ref,
                 wp_ref, bp_ref,
                 out_ref):
    # Layer 1 (rating embeddings + rating_layer1, folded into GU/GI tables):
    # h1 = relu(GU[u] + GI[i] + b1)   -- pure VPU work, no matmul left here.
    h1 = (gu_ref[...].astype(jnp.float32)
          + gi_ref[...].astype(jnp.float32)
          + b1_ref[...])
    h1 = jnp.maximum(h1, 0.0)

    # rating_layer2: (tb,256) @ (256,128), f32 accumulation.
    h2 = jnp.dot(h1.astype(w2_ref.dtype), w2_ref[...],
                 preferred_element_type=jnp.float32) + b2_ref[...]
    h2 = jnp.maximum(h2, 0.0)

    # rating_layer3 (factor dim zero-padded to 128 lanes -> lane-dense matmul).
    h3 = jnp.dot(h2.astype(w3_ref.dtype), w3_ref[...],
                 preferred_element_type=jnp.float32) + b3_ref[...]
    h3 = jnp.maximum(h3, 0.0)

    # predict: contract the factor dim with wp (stored (8, fp), row 0 real,
    # rows 1..7 zero).  trans-B dot_general puts the batch on the LANE axis,
    # so the (1, tb) output store is unmasked / lane-dense.
    pred = lax.dot_general(wp_ref[...], h3,
                           dimension_numbers=(((1,), (1,)), ((), ())),
                           preferred_element_type=jnp.float32)   # (8, tb)
    out_ref[...] = pred[0:1, :] + bp_ref[...]


def prepare_params(params, rating_matrix):
    """One-time prep.  Requires the rating matrix to be static between
    forwards (true for this module: it is a fixed constructor buffer)."""
    nf = params["w3"].shape[0]                       # num_factors
    fp = max(128, pl.cdiv(nf, 128) * 128)            # padded factor dim

    R = rating_matrix.astype(jnp.float32)
    wue_t = params["w_user_emb"].T.astype(jnp.float32)    # (num_items+1, 256)
    wie_t = params["w_item_emb"].T.astype(jnp.float32)    # (num_users+1, 256)
    w1_t = params["w1"].T.astype(jnp.float32)              # (512, 256)
    wu = wue_t @ w1_t[:256, :]                              # (num_items+1, 256)
    wi = wie_t @ w1_t[256:, :]                              # (num_users+1, 256)

    # Exact: (R[u] @ wu) == (R @ wu)[u]  and  (R[:,i].T @ wi) == (R.T @ wi)[i].
    gu = (R @ wu).astype(jnp.bfloat16)      # (num_users+1, 256), user-indexed
    gi = (R.T @ wi).astype(jnp.bfloat16)    # (num_items+1, 256), item-indexed

    wp = jnp.zeros((8, fp), jnp.float32)
    wp = wp.at[0, :nf].set(params["wp"].reshape(-1))

    return {
        "gu": gu,
        "gi": gi,
        "b1": params["b1"].reshape(1, -1).astype(jnp.float32),
        "w2": params["w2"].T.astype(jnp.bfloat16),            # (256, 128)
        "b2": params["b2"].reshape(1, -1).astype(jnp.float32),
        "w3": jnp.pad(params["w3"].T,
                      ((0, 0), (0, fp - nf))).astype(jnp.bfloat16),  # (128, fp)
        "b3": jnp.pad(params["b3"],
                      (0, fp - nf)).reshape(1, -1).astype(jnp.float32),
        "wp": wp,                                              # (8, fp)
        "bp": params["bp"].reshape(1, 1).astype(jnp.float32),
    }


def drtnn_forward(x, prep, *, block_batch=256):
    """x: int32 [B, 2] (user_index, item_index) pairs."""
    B = x.shape[0]
    tb = min(block_batch, max(8, pl.cdiv(B, 8) * 8))   # keep sublane-aligned
    n_tiles = pl.cdiv(B, tb)
    b_pad = n_tiles * tb

    uidx = jnp.pad(x[:, 0], (0, b_pad - B))
    iidx = jnp.pad(x[:, 1], (0, b_pad - B))
    # Tiny (b_pad, 256) bf16 row gathers of the precomputed tables (already
    # bf16, so no per-call cast pass over HBM).
    # TODO(synk): for very large batches, move this gather in-kernel
    # (scalar-prefetched indices + pl.ANY HBM tables + per-row
    # pltpu.make_async_copy) to skip the pre-kernel HBM round trip.
    gu = prep["gu"][uidx, :]
    gi = prep["gi"][iidx, :]

    h = prep["b1"].shape[1]      # 256

    def resident(arr):   # same block every step -> DMA'd once, stays in VMEM
        return pl.BlockSpec(arr.shape, lambda i: (0, 0))

    out = pl.pallas_call(
        drtnn_kernel,
        out_shape=jax.ShapeDtypeStruct((n_tiles, tb), jnp.float32),
        grid=(n_tiles,),
        in_specs=[
            pl.BlockSpec((tb, h), lambda i: (i, 0)),        # gu rows: tiled
            pl.BlockSpec((tb, h), lambda i: (i, 0)),        # gi rows: tiled
            resident(prep["b1"]),
            resident(prep["w2"]), resident(prep["b2"]),
            resident(prep["w3"]), resident(prep["b3"]),
            resident(prep["wp"]), resident(prep["bp"]),
        ],
        out_specs=pl.BlockSpec((1, tb), lambda i: (i, 0)),   # lane-dense
        compiler_params=pltpu.CompilerParams(
            # Megacore split of batch tiles on v7x; no-op on v5e/v6e.
            dimension_semantics=("parallel",),
            # VMEM footprint ~1.5 MiB (double-buffered (tb,256) bf16 tiles +
            # <0.2 MiB resident weights) fits the default scoped limit on all
            # generations -- deliberately NOT requesting 64 MiB (v7x physical).
        ),
    )(gu, gi, prep["b1"], prep["w2"], prep["b2"], prep["w3"], prep["b3"],
      prep["wp"], prep["bp"])

    return out.reshape(-1)[:B].reshape(B, 1)


def drtnn_ref(x, R, p):
    """Pure-JAX f32 reference mirroring the PyTorch forward exactly."""
    uv = R[x[:, 0], :]
    iv = R[:, x[:, 1]].T
    ur = uv @ p["w_user_emb"].T
    ir = iv @ p["w_item_emb"].T
    h1 = jax.nn.relu(jnp.concatenate([ur, ir], axis=1) @ p["w1"].T + p["b1"])
    h2 = jax.nn.relu(h1 @ p["w2"].T + p["b2"])
    h3 = jax.nn.relu(h2 @ p["w3"].T + p["b3"])
    return h3 @ p["wp"].T + p["bp"]


def init_params(key, num_users, num_items, num_factors):
    ks = jax.random.split(key, 10)

    def u(k, shape, fan_in):
        bound = 1.0 / jnp.sqrt(fan_in)
        return jax.random.uniform(k, shape, jnp.float32, -bound, bound)

    return {
        "w_user_emb": u(ks[0], (256, num_items + 1), num_items + 1),
        "w_item_emb": u(ks[1], (256, num_users + 1), num_users + 1),
        "w1": u(ks[2], (256, 512), 512),
        "b1": u(ks[3], (256,), 512),
        "w2": u(ks[4], (128, 256), 256),
        "b2": u(ks[5], (128,), 256),
        "w3": u(ks[6], (num_factors, 128), 128),
        "b3": u(ks[7], (num_factors,), 128),
        "wp": u(ks[8], (1, num_factors), num_factors),
        "bp": u(ks[9], (1,), num_factors),
    }


if __name__ == "__main__":
    key = jax.random.PRNGKey(0)
    num_users, num_items, num_factors = 12, 20, 32
    batch = 4

    k_r, k_p, k_u, k_i = jax.random.split(key, 4)
    train_rating_matrix = jax.random.uniform(
        k_r, (num_users + 1, num_items + 1), jnp.float32, 0.0, 5.0)
    params = init_params(k_p, num_users, num_items, num_factors)
    prep = prepare_params(params, train_rating_matrix)   # one-time prep

    user_idx = jax.random.randint(k_u, (batch,), 0, num_users + 1)
    item_idx = jax.random.randint(k_i, (batch,), 0, num_items + 1)
    x = jnp.stack([user_idx, item_idx], axis=1).astype(jnp.int32)   # [B, 2]

    out = drtnn_forward(x, prep)
    jax.block_until_ready(out)

    ref = drtnn_ref(x, train_rating_matrix, params)
    assert out.shape == (batch, 1)
    # bf16 gather tables / weights with f32 accumulation -> loosened tolerance.
    assert jnp.allclose(out, ref, atol=5e-2, rtol=5e-2)

    print("KERNEL_OK")
</pallas_src>

<mosaic_0001>
module attributes {stable_mosaic.version = 11 : i64} {
  func.func @drtnn_kernel(%arg0: i32, %arg1: memref<8x256xbf16, #tpu.memory_space<vmem>>, %arg2: memref<8x256xbf16, #tpu.memory_space<vmem>>, %arg3: memref<1x256xf32, #tpu.memory_space<vmem>>, %arg4: memref<256x128xbf16, #tpu.memory_space<vmem>>, %arg5: memref<1x128xf32, #tpu.memory_space<vmem>>, %arg6: memref<128x128xbf16, #tpu.memory_space<vmem>>, %arg7: memref<1x128xf32, #tpu.memory_space<vmem>>, %arg8: memref<8x128xf32, #tpu.memory_space<vmem>>, %arg9: memref<1x1xf32, #tpu.memory_space<vmem>>, %arg10: memref<1x8xf32, #tpu.memory_space<vmem>>) attributes {dimension_semantics = [#tpu.dimension_semantics<parallel>], iteration_bounds = array<i64: 1>, scalar_prefetch = 0 : i64, scratch_operands = 0 : i64, tpu.core_type = #tpu.core_type<tc>, window_params = [{transform_indices = @transform_0, window_bounds = array<i64: 8, 256>}, {transform_indices = @transform_1, window_bounds = array<i64: 8, 256>}, {pipeline_mode = #tpu.pipeline_mode<synchronous>, transform_indices = @transform_2, window_bounds = array<i64: 1, 256>}, {pipeline_mode = #tpu.pipeline_mode<synchronous>, transform_indices = @transform_3, window_bounds = array<i64: 256, 128>}, {pipeline_mode = #tpu.pipeline_mode<synchronous>, transform_indices = @transform_4, window_bounds = array<i64: 1, 128>}, {pipeline_mode = #tpu.pipeline_mode<synchronous>, transform_indices = @transform_5, window_bounds = array<i64: 128, 128>}, {pipeline_mode = #tpu.pipeline_mode<synchronous>, transform_indices = @transform_6, window_bounds = array<i64: 1, 128>}, {pipeline_mode = #tpu.pipeline_mode<synchronous>, transform_indices = @transform_7, window_bounds = array<i64: 8, 128>}, {pipeline_mode = #tpu.pipeline_mode<synchronous>, transform_indices = @transform_8, window_bounds = array<i64: 1, 1>}, {transform_indices = @transform_9, window_bounds = array<i64: 1, 8>}]} {
    %c0 = arith.constant 0 : index
    %c0_0 = arith.constant 0 : index
    %0 = vector.load %arg1[%c0, %c0_0] : memref<8x256xbf16, #tpu.memory_space<vmem>>, vector<8x256xbf16>
    %1 = arith.extf %0 : vector<8x256xbf16> to vector<8x256xf32>
    %c0_1 = arith.constant 0 : index
    %c0_2 = arith.constant 0 : index
    %2 = vector.load %arg2[%c0_1, %c0_2] : memref<8x256xbf16, #tpu.memory_space<vmem>>, vector<8x256xbf16>
    %3 = arith.extf %2 : vector<8x256xbf16> to vector<8x256xf32>
    %4 = arith.addf %1, %3 : vector<8x256xf32>
    %c0_3 = arith.constant 0 : index
    %c0_4 = arith.constant 0 : index
    %5 = vector.load %arg3[%c0_3, %c0_4] : memref<1x256xf32, #tpu.memory_space<vmem>>, vector<1x256xf32>
    %6 = vector.broadcast %5 : vector<1x256xf32> to vector<8x256xf32>
    %7 = arith.addf %4, %6 : vector<8x256xf32>
    %cst = arith.constant 0.000000e+00 : f32
    %8 = vector.broadcast %cst : f32 to vector<8x256xf32>
    %9 = arith.maximumf %7, %8 : vector<8x256xf32>
    %10 = arith.truncf %9 : vector<8x256xf32> to vector<8x256xbf16>
    %c0_5 = arith.constant 0 : index
    %c0_6 = arith.constant 0 : index
    %11 = vector.load %arg4[%c0_5, %c0_6] : memref<256x128xbf16, #tpu.memory_space<vmem>>, vector<256x128xbf16>
    %cst_7 = arith.constant dense<0.000000e+00> : vector<8x128xf32>
    %12 = tpu.matmul %10, %11, %cst_7 {dimension_numbers = #tpu.dot_dimension_numbers<[1], [0], [0], [1], [0, 0, 1, 1], [], []>} : vector<8x256xbf16>, vector<256x128xbf16>, vector<8x128xf32> -> vector<8x128xf32>
    %c0_8 = arith.constant 0 : index
    %c0_9 = arith.constant 0 : index
    %13 = vector.load %arg5[%c0_8, %c0_9] : memref<1x128xf32, #tpu.memory_space<vmem>>, vector<1x128xf32>
    %14 = vector.broadcast %13 : vector<1x128xf32> to vector<8x128xf32>
    %15 = arith.addf %12, %14 : vector<8x128xf32>
    %cst_10 = arith.constant 0.000000e+00 : f32
    %16 = vector.broadcast %cst_10 : f32 to vector<8x128xf32>
    %17 = arith.maximumf %15, %16 : vector<8x128xf32>
    %18 = arith.truncf %17 : vector<8x128xf32> to vector<8x128xbf16>
    %c0_11 = arith.constant 0 : index
    %c0_12 = arith.constant 0 : index
    %19 = vector.load %arg6[%c0_11, %c0_12] : memref<128x128xbf16, #tpu.memory_space<vmem>>, vector<128x128xbf16>
    %cst_13 = arith.constant dense<0.000000e+00> : vector<8x128xf32>
    %20 = tpu.matmul %18, %19, %cst_13 {dimension_numbers = #tpu.dot_dimension_numbers<[1], [0], [0], [1], [0, 0, 1, 1], [], []>} : vector<8x128xbf16>, vector<128x128xbf16>, vector<8x128xf32> -> vector<8x128xf32>
    %c0_14 = arith.constant 0 : index
    %c0_15 = arith.constant 0 : index
    %21 = vector.load %arg7[%c0_14, %c0_15] : memref<1x128xf32, #tpu.memory_space<vmem>>, vector<1x128xf32>
    %22 = vector.broadcast %21 : vector<1x128xf32> to vector<8x128xf32>
    %23 = arith.addf %20, %22 : vector<8x128xf32>
    %cst_16 = arith.constant 0.000000e+00 : f32
    %24 = vector.broadcast %cst_16 : f32 to vector<8x128xf32>
    %25 = arith.maximumf %23, %24 : vector<8x128xf32>
    %c0_17 = arith.constant 0 : index
    %c0_18 = arith.constant 0 : index
    %26 = vector.load %arg8[%c0_17, %c0_18] : memref<8x128xf32, #tpu.memory_space<vmem>>, vector<8x128xf32>
    %cst_19 = arith.constant dense<0.000000e+00> : vector<8x8xf32>
    %27 = tpu.matmul %26, %25, %cst_19 {dimension_numbers = #tpu.dot_dimension_numbers<[1], [1], [0], [0], [0, 0, 1, 0], [], []>} : vector<8x128xf32>, vector<8x128xf32>, vector<8x8xf32> -> vector<8x8xf32>
    %28 = vector.extract_strided_slice %27 {offsets = [0, 0], sizes = [1, 8], strides = [1, 1]} : vector<8x8xf32> to vector<1x8xf32>
    %c0_20 = arith.constant 0 : index
    %c0_21 = arith.constant 0 : index
    %29 = vector.load %arg9[%c0_20, %c0_21] : memref<1x1xf32, #tpu.memory_space<vmem>>, vector<1x1xf32>
    %30 = vector.broadcast %29 : vector<1x1xf32> to vector<1x8xf32>
    %31 = arith.addf %28, %30 : vector<1x8xf32>
    %c0_22 = arith.constant 0 : index
    %c0_23 = arith.constant 0 : index
    %32 = vector.load %arg10[%c0_22, %c0_23] : memref<1x8xf32, #tpu.memory_space<vmem>>, vector<1x8xf32>
    tpu.vector_store %arg10[%c0_22, %c0_23], %31 {strides = array<i32>} : memref<1x8xf32, #tpu.memory_space<vmem>>, vector<1x8xf32>,
    return
  }
  func.func @transform_0(%arg0: i32) -> (i32, i32) {
    %c0_i32 = arith.constant 0 : i32
    %c0_i32_0 = arith.constant 0 : i32
    return %arg0, %c0_i32 : i32, i32
  }
  func.func @transform_1(%arg0: i32) -> (i32, i32) {
    %c0_i32 = arith.constant 0 : i32
    %c0_i32_0 = arith.constant 0 : i32
    return %arg0, %c0_i32 : i32, i32
  }
  func.func @transform_2(%arg0: i32) -> (i32, i32) {
    %c0_i32 = arith.constant 0 : i32
    %c0_i32_0 = arith.constant 0 : i32
    %c0_i32_1 = arith.constant 0 : i32
    return %c0_i32, %c0_i32_0 : i32, i32
  }
  func.func @transform_3(%arg0: i32) -> (i32, i32) {
    %c0_i32 = arith.constant 0 : i32
    %c0_i32_0 = arith.constant 0 : i32
    %c0_i32_1 = arith.constant 0 : i32
    return %c0_i32, %c0_i32_0 : i32, i32
  }
  func.func @transform_4(%arg0: i32) -> (i32, i32) {
    %c0_i32 = arith.constant 0 : i32
    %c0_i32_0 = arith.constant 0 : i32
    %c0_i32_1 = arith.constant 0 : i32
    return %c0_i32, %c0_i32_0 : i32, i32
  }
  func.func @transform_5(%arg0: i32) -> (i32, i32) {
    %c0_i32 = arith.constant 0 : i32
    %c0_i32_0 = arith.constant 0 : i32
    %c0_i32_1 = arith.constant 0 : i32
    return %c0_i32, %c0_i32_0 : i32, i32
  }
  func.func @transform_6(%arg0: i32) -> (i32, i32) {
    %c0_i32 = arith.constant 0 : i32
    %c0_i32_0 = arith.constant 0 : i32
    %c0_i32_1 = arith.constant 0 : i32
    return %c0_i32, %c0_i32_0 : i32, i32
  }
  func.func @transform_7(%arg0: i32) -> (i32, i32) {
    %c0_i32 = arith.constant 0 : i32
    %c0_i32_0 = arith.constant 0 : i32
    %c0_i32_1 = arith.constant 0 : i32
    return %c0_i32, %c0_i32_0 : i32, i32
  }
  func.func @transform_8(%arg0: i32) -> (i32, i32) {
    %c0_i32 = arith.constant 0 : i32
    %c0_i32_0 = arith.constant 0 : i32
    %c0_i32_1 = arith.constant 0 : i32
    return %c0_i32, %c0_i32_0 : i32, i32
  }
  func.func @transform_9(%arg0: i32) -> (i32, i32) {
    %c0_i32 = arith.constant 0 : i32
    %c0_i32_0 = arith.constant 0 : i32
    return %arg0, %c0_i32 : i32, i32
  }
}

</mosaic_0001>

<bundles_post_ra>
// kernel: tpu_custom_call.1
= control target key start
LH: loop header
LB: loop body
LE: loop exit
PB: predicated region body
PF: predicated region fallthrough
CT: control target
= control target key end

     0   :  { %s839_s0 = inlined_call_operand.hbm [shape: bf16[8,256], index: 0, kind: input, shape index: {}]   ;;  %s840_s1 = inlined_call_operand.hbm [shape: bf16[8,256], index: 1, kind: input, shape index: {}]   ;;  %s841_s2 = inlined_call_operand.vmem [shape: f32[1,256], index: 2, kind: input, shape index: {}]   ;;  %s842_s3 = inlined_call_operand.hbm [shape: bf16[256,128], index: 3, kind: input, shape index: {}]   ;;  %s843_s4 = inlined_call_operand.vmem [shape: f32[1,128], index: 4, kind: input, shape index: {}]   ;;  %s844_s5 = inlined_call_operand.hbm [shape: bf16[128,128], index: 5, kind: input, shape index: {}]   ;;  %s845_s6 = inlined_call_operand.vmem [shape: f32[1,128], index: 6, kind: input, shape index: {}]   ;;  %s846_s7 = inlined_call_operand.vmem [shape: f32[8,128], index: 7, kind: input, shape index: {}]   ;;  %s847_s8 = inlined_call_operand.<no memory space> [shape: f32[1,1], index: 8, kind: input, shape index: {}]   ;;  %s848_s9 = inlined_call_operand.hbm [shape: f32[1,8], index: 9, kind: output, shape index: {}]  }
   0x1   :  { %v14_v0 = vstv %s847_s8 }
   0x2   :  { %15 = vst [vmem:[#allocation2] sm:$0x1] %v14_v0 }
   0x3   :  { %16 = vsyncpa [#allocation4], 0 }
   0x4   :  { %17 = vsyncpa [#allocation7], 0 }
   0x5   :  { %18 = vsyncpa [#allocation10], 0 }
   0x6   :  { %19 = vsyncpa [#allocation5], 0  ;;  %s730_s11 = smov [#allocation6]   ;;  %s731_s13 = smov [#allocation3]  }
   0x7   :  { %s36_s12 = sshll.u32 %s730_s11, 4  ;;  %s26_s14 = sshll.u32 %s731_s13, 4  ;;  %s37_s12 = int_to_ptr.vmem [resolvable:$true] %s36_s12  ;;  %s27_s14 = int_to_ptr.vmem [resolvable:$true] %s26_s14 }
   0x8   :  { %s630_s15 = scalar_lea.vmem %s37_s12, 128  ;;  %p635_p1 = scmp.lt.s32.totalorder %s37_s12, %s37_s12 }
   0x9   :  { %p631_p0 = scmp.ne.s32.totalorder %s37_s12, %s630_s15  ;;  %p636_p2 = scmp.lt.s32.totalorder %s630_s15, %s630_s15 }
   0xb   :  { %p637_p3 = por %p636_p2, %p635_p1 }
   0xd   :  { %p638_p4 = pnand %p637_p3, %p631_p0 }
   0xf   :  { %641 = shalt.err (!%p638_p4)
}
  0x10   :  { %39 = dma.hbm_to_vmem [thread:$0]  %s840_s1, 128, %s37_s12, [#allocation7]  }
  0x11   :  { %s650_s17 = scalar_lea.vmem %s27_s14, 128  ;;  %p655_p6 = scmp.lt.s32.totalorder %s27_s14, %s27_s14 }
  0x12   :  { %p651_p5 = scmp.ne.s32.totalorder %s27_s14, %s650_s17  ;;  %p656_p7 = scmp.lt.s32.totalorder %s650_s17, %s650_s17 }
  0x14   :  { %p657_p8 = por %p656_p7, %p655_p6 }
  0x16   :  { %p658_p9 = pnand %p657_p8, %p651_p5 }
  0x18   :  { %661 = shalt.err (!%p658_p9)
}
  0x19   :  { %29 = dma.hbm_to_vmem [thread:$0]  %s839_s0, 128, %s27_s14, [#allocation4]  }
  0x1a   :  { %s732_s20 = smov [#allocation8]  }
  0x1b   :  { %s47_s21 = sshll.u32 %s732_s20, 4  ;;  %s48_s21 = int_to_ptr.vmem [resolvable:$true] %s47_s21 }
  0x1c   :  { %s670_s22 = scalar_lea.vmem %s48_s21, 2048  ;;  %p675_p11 = scmp.lt.s32.totalorder %s48_s21, %s48_s21 }
  0x1d   :  { %p671_p10 = scmp.ne.s32.totalorder %s48_s21, %s670_s22  ;;  %p676_p12 = scmp.lt.s32.totalorder %s670_s22, %s670_s22 }
  0x1f   :  { %p677_p13 = por %p676_p12, %p675_p11 }
  0x21   :  { %p678_p0 = pnand %p677_p13, %p671_p10 }
  0x23   :  { %681 = shalt.err (!%p678_p0)
}
  0x24   :  { %s733_s1 = smov 64   ;;  %s734_s23 = smov 4  }
  0x25   :  { %53 = dma.hbm_to_vmem [thread:$0]  %s842_s3, 2048, %s48_s21, [#allocation7], %s733_s1, %s733_s1, %s734_s23  }
  0x26   :  { %s735_s26 = smov [#allocation9]  }
  0x27   :  { %s61_s27 = sshll.u32 %s735_s26, 4  ;;  %s62_s27 = int_to_ptr.vmem [resolvable:$true] %s61_s27 }
  0x28   :  { %s690_s0 = scalar_lea.vmem %s62_s27, 1024  ;;  %p695_p2 = scmp.lt.s32.totalorder %s62_s27, %s62_s27 }
  0x29   :  { %p691_p1 = scmp.ne.s32.totalorder %s62_s27, %s690_s0  ;;  %p696_p3 = scmp.lt.s32.totalorder %s690_s0, %s690_s0 }
  0x2b   :  { %p697_p4 = por %p696_p3, %p695_p2 }
  0x2d   :  { %p698_p5 = pnand %p697_p4, %p691_p1 }
  0x2f   :  { %701 = shalt.err (!%p698_p5)
}
  0x30   :  { %67 = dma.hbm_to_vmem [thread:$0]  %s844_s5, 1024, %s62_s27, [#allocation10], %s733_s1, %s733_s1, %s734_s23  }
  0x31   :  { %722 = dma.done.wait [#allocation4], 128  }
  0x32   :  { %723 = vsyncadd [#allocation4], 4294967168 }
  0x33   :  { %724 = dma.done.wait [#allocation7], 2176  }
  0x34   :  { %725 = vsyncadd [#allocation7], 4294965120 }
  0x35   :  { %726 = dma.done.wait [#allocation10], 1024  }
  0x36   :  { %727 = vsyncadd [#allocation10], 4294966272  ;;  %v736_v1 = vmov 0.0   ;;  %v598_v2 = vld [vmem:[#allocation8 + $0x78] sm:$0xff]   ;;  %v600_v4 = vld [vmem:[#allocation8 + $0x70] sm:$0xff]   ;;  %v97_v7 = vlaneseq  ;;  %vm737_vm0 = vmmov 0  }
  0x37   :  { %562 = vmatprep.subr.bf16.mxu1 %v736_v1  ;;  %v599_v3 = vld [vmem:[#allocation8 + $0x38] sm:$0xff]   ;;  %529 = vmatprep.subr.bf16.mxu0 %v598_v2  ;;  %v601_v5 = vld [vmem:[#allocation8 + $0x30] sm:$0xff]   ;;  %v602_v6 = vld [vmem:[#allocation8 + $0x68] sm:$0xff]   ;;  %v738_v57 = vmov 0   ;;  %s739_s13 = smov [#allocation11]   ;;  %vm484_vm1 = vcmask 57344  }
  0x38   :  { %530 = vmatpush3.bf16.msra.mxu0 %v599_v3  ;;  %v603_v8 = vld [vmem:[#allocation8 + $0x28] sm:$0xff]   ;;  %v604_v9 = vld [vmem:[#allocation8 + $0x60] sm:$0xff]   ;;  %v806_v10 = vshrl.u32 %v97_v7, 7  ;;  %v606_v12 = vld [vmem:[#allocation8 + $0x58] sm:$0xff]   ;;  %578 = vmatprep.mubr.msk.bf16.mxu1 %vm737_vm0, %v736_v1  ;;  %s492_s14 = sshll.u32 %s739_s13, 4  ;;  %s493_s14 = int_to_ptr.vmem [resolvable:$true] %s492_s14 }
  0x39   :  { %531 = vmatprep.subr.bf16.mxu0 %v600_v4  ;;  %v605_v11 = vld [vmem:[#allocation8 + $0x20] sm:$0xff]   ;;  %v607_v14 = vld [vmem:[#allocation8 + $0x18] sm:$0xff]   ;;  %v608_v16 = vld [vmem:[#allocation8 + $0x50] sm:$0xff]   ;;  %597 = vset.pattern.permute.xlu0 %v738_v57  ;;  %s706_s15 = scalar_lea.vmem %s493_s14, 32  ;;  %p707_p7 = scmp.lt.s32.totalorder %s493_s14, %s493_s14 }
  0x3a   :  { %v99_v13 = vsub.s32 0, %v806_v10  ;;  %v103_v15 = vsub.s32 1, %v806_v10  ;;  %v87_v17 = vld [vmem:[#allocation3] sm:$0xff]  ;;  %v90_v18 = vld [vmem:[#allocation6] sm:$0xff]  ;;  %v610_v31 = vld [vmem:[#allocation8 + $0x48] sm:$0xff]  }
  0x3b   :  { %v95_v19 = vld [vmem:[%s841_s2] sm:$0x3]  ;;  %v88_v20 = vunpack.c.l.bf16 %v87_v17  ;;  %v89_v21 = vunpack.c.h.bf16 %v87_v17  ;;  %v91_v22 = vunpack.c.l.bf16 %v90_v18  ;;  %v92_v23 = vunpack.c.h.bf16 %v90_v18  ;;  %v614_v24 = vld [vmem:[#allocation9 + $0x38] sm:$0xff]   ;;  %v612_v36 = vld [vmem:[#allocation8 + $0x40] sm:$0xff]  }
  0x3c   :  { %532 = vmatpush3.bf16.msra.mxu0 %v601_v5  ;;  %v609_v25 = vld [vmem:[#allocation8 + $0x10] sm:$0xff]   ;;  %v100_v26 = vrot.slane %v95_v19, %v99_v13  ;;  %v104_v27 = vrot.slane %v95_v19, %v103_v15  ;;  %563 = vmatpush3.bf16.msra.mxu1 %v614_v24  ;;  %v611_v34 = vld [vmem:[#allocation8 + $0x8] sm:$0xff]   ;;  %v613_v40 = vld [vmem:[#allocation8] sm:$0xff]  }
  0x3d   :  { %533 = vmatprep.subr.bf16.mxu0 %v602_v6  ;;  %v94_v28 = vadd.f32 %v92_v23, %v89_v21  ;;  %v93_v29 = vadd.f32 %v91_v22, %v88_v20  ;;  %v615_v30 = vld [vmem:[#allocation9 + $0x30] sm:$0xff]   ;;  %564 = vmatprep.subr.bf16.mxu1 %v736_v1  ;;  %v616_v37 = vld [vmem:[#allocation9 + $0x28] sm:$0xff]   ;;  %v617_v41 = vld [vmem:[#allocation9 + $0x20] sm:$0xff]  }
  0x3e   :  { %v618_v43 = vld [vmem:[#allocation9 + $0x18] sm:$0xff]   ;;  %v619_v44 = vld [vmem:[#allocation9 + $0x10] sm:$0xff]   ;;  %v620_v45 = vld [vmem:[#allocation9 + $0x8] sm:$0xff]  }
  0x3f   :  { %v108_v32 = vadd.f32 %v104_v27, %v94_v28  ;;  %v107_v33 = vadd.f32 %v100_v26, %v93_v29  ;;  %v621_v46 = vld [vmem:[#allocation9] sm:$0xff]   ;;  %v503_v48 = vld [vmem:[%s843_s4] ss:$0 sm:$0xff] }
  0x40   :  { %534 = vmatpush3.bf16.msra.mxu0 %v603_v8  ;;  %565 = vmatpush3.bf16.msra.mxu1 %v615_v30  ;;  %v473_v56 = vld [vmem:[#allocation2] sm:$0x1] }
  0x41   :  { %535 = vmatprep.subr.bf16.mxu0 %v604_v9  ;;  %v110_v35 = vmax.f32 %v108_v32, 0.0  ;;  %566 = vmatprep.subr.bf16.mxu1 %v736_v1  ;;  %v109_v39 = vmax.f32 %v107_v33, 0.0  ;;  %v520_v58 = vld [vmem:[%s845_s6] ss:$0 sm:$0xff]  ;;  %s702_s6 = scalar_lea.vmem %s493_s14, 16 }
  0x42   :  { %476 = vperm.xlu0 %597, %v473_v56   ;;  %v402_v0 = vld [vmem:[%s846_s7] sm:$0xff]  ;;  %p703_p6 = scmp.ne.s32.totalorder %s493_s14, %s702_s6  ;;  %p708_p8 = scmp.lt.s32.totalorder %s706_s15, %s702_s6 }
  0x43   :  { %v112_v38 = vpack.c.bf16 %v110_v35, %v110_v35  ;;  %v111_v42 = vpack.c.bf16 %v109_v39, %v109_v39 }
  0x44   :  { %536 = vmatpush3.bf16.msra.mxu0 %v605_v11  ;;  %567 = vmatpush3.bf16.msra.mxu1 %v616_v37  ;;  %p709_p9 = por %p708_p8, %p707_p7 }
  0x45   :  { %537 = vmatprep.subr.bf16.mxu0 %v606_v12  ;;  %280 = vmatprep.mubr.bf16.mxu0 %v112_v38 }
  0x46   :  { %568 = vmatprep.subr.bf16.mxu1 %v736_v1  ;;  %p710_p10 = pnand %p709_p9, %p703_p6 }
  0x48   :  { %538 = vmatpush3.bf16.msra.mxu0 %v607_v14  ;;  %569 = vmatpush3.bf16.msra.mxu1 %v617_v41 }
  0x49   :  { %539 = vmatprep.subr.bf16.mxu0 %v608_v16  ;;  %570 = vmatprep.subr.bf16.mxu1 %v736_v1 }
  0x4c   :  { %540 = vmatpush3.bf16.msra.mxu0 %v609_v25  ;;  %571 = vmatpush3.bf16.msra.mxu1 %v618_v43 }
  0x4d   :  { %541 = vmatprep.subr.bf16.mxu0 %v610_v31  ;;  %572 = vmatprep.subr.bf16.mxu1 %v736_v1 }
  0x50   :  { %542 = vmatpush3.bf16.msra.mxu0 %v611_v34  ;;  %573 = vmatpush3.bf16.msra.mxu1 %v619_v44 }
  0x51   :  { %543 = vmatprep.subr.bf16.mxu0 %v612_v36  ;;  %574 = vmatprep.subr.bf16.mxu1 %v736_v1 }
  0x54   :  { %544 = vmatpush3.bf16.msra.mxu0 %v613_v40  ;;  %575 = vmatpush3.bf16.msra.mxu1 %v620_v45 }
  0x55   :  { %582 = vmatprep.subr.mxu0 %v736_v1  ;;  %576 = vmatprep.subr.bf16.mxu1 %v736_v1 }
  0x57   :  { %281 = vmatmul.mubr.bf16.vlgmr.msra.gmra.mxu0 %v111_v42 }
  0x58   :  { %577 = vmatpush3.bf16.msra.mxu1 %v621_v46  ;;  %584 = vmatprep.mubr.msk.f32.mxu0 %vm737_vm0, %v736_v1 }
  0xbd   :  { %v477_v2 = vpop.permute.xlu0 %476 }
  0xbe   :  { %v482_v3 = vrot.slane %v477_v2, %v99_v13 }
 0x117   :  { %v545_v47 = vpop.f32.mrf.mxu0 }
 0x119   :  { %v546_v49 = vpop.f32.mrf.mxu0 }
 0x11a   :  { %v547_v50 = vadd.f32 %v546_v49, %v545_v47 }
 0x11b   :  { %v548_v51 = vpop.f32.mrf.mxu0 }
 0x11c   :  { %v283_v52 = vadd.f32 %v547_v50, %v503_v48 }
 0x11d   :  { %v549_v53 = vpop.f32.mrf.mxu0 }
 0x11e   :  { %v288_v54 = vmax.f32 %v283_v52, 0.0 }
 0x120   :  { %v289_v55 = vpack.c.bf16 %v288_v54, %v288_v54 }
 0x122   :  { %579 = vmatmul.mubr.bf16.vlgmr.msra.gmra.mxu1 %v289_v55 }
 0x1e2   :  { %v395_v59 = vpop.f32.mrf.mxu1 }
 0x1e3   :  { %v396_v60 = vadd.f32 %v520_v58, %v395_v59 }
 0x1e4   :  { %v580_v61 = vpop.f32.mrf.mxu1 }
 0x1e5   :  { %v401_v62 = vmax.f32 %v396_v60, 0.0 }
 0x1e6   :  { %v398_v63 = vpop.f32.mrf.mxu1 }
 0x1e7   :  { %583 = vmatpush3.xpose.msra.mxu0 %v401_v62 }
 0x1e8   :  { %v581_v1 = vpop.f32.mrf.mxu1 }
 0x1ea   :  { %585 = vmatmul.mubr.f32.vlgmr.msra.gmra.mxu0 %v402_v0 }
 0x2aa   :  { %v469_v4 = vpop.f32.mrf.mxu0 }
 0x2ab   :  { %v483_v5 = vadd.f32 %v482_v3, %v469_v4 }
 0x2ac   :  { %v586_v6 = vpop.f32.mrf.mxu0 }
 0x2ad   :  { %485 = vst.msk [vmem:[#allocation11] sm:$0x1] %vm484_vm1, %v483_v5 }
 0x2ae   :  { %713 = shalt.err (!%p710_p10)
}
 0x2af   :  { %495 = dma.vmem_to_hbm [thread:$0]  %s493_s14, 16, %s848_s9, [#allocation5]  }
 0x2b0   :  { %728 = dma.done.wait [#allocation5], 16  }
 0x2b1   :  { %729 = vsyncadd [#allocation5], 4294967280 }
 0x2b2   :  { %499 = vsyncpa [#allocation4], 1 }
 0x2b3   :  { %500 = vsyncpa [#allocation7], 1 }
 0x2b4   :  { %501 = vsyncpa [#allocation10], 1 }
 0x2b5   :  { %502 = vsyncpa [#allocation5], 1 }

</bundles_post_ra>
